<compile_context>
chip_gen: v5e
topology: v5e:2x2
jax: 0.10.0
libtpu: 0.0.40
codegen_flags: <defaults>
</compile_context>

<pallas_src>
import functools

import jax
import jax.numpy as jnp
from jax.experimental import pallas as pl
from jax.experimental.pallas import tpu as pltpu

_LANES = 128


def focal_loss_kernel(x_ref, t_ref, o_ref, acc_ref, *,
                      alpha, gamma, n_valid, tm, masked):
    i = pl.program_id(0)

    @pl.when(i == 0)
    def _init():
        acc_ref[...] = jnp.zeros_like(acc_ref)

    p = x_ref[...].astype(jnp.float32)
    t = t_ref[...].astype(jnp.float32)

    # binary_cross_entropy (reduction='none'); PyTorch clamps log terms at -100.
    log_p = jnp.maximum(jnp.log(p), -100.0)
    log_1mp = jnp.maximum(jnp.log(1.0 - p), -100.0)
    bce = -(t * log_p + (1.0 - t) * log_1mp)

    pt = jnp.exp(-bce)
    one_minus_pt = 1.0 - pt
    # gamma is static Python; avoid a pow -> exp(log) lowering for common cases.
    if gamma == 2:
        mod = one_minus_pt * one_minus_pt
    elif gamma == 1:
        mod = one_minus_pt
    elif gamma == 0:
        mod = jnp.ones_like(one_minus_pt)
    else:
        mod = jnp.power(one_minus_pt, gamma)
    f_loss = alpha * mod * bce

    if masked:
        # Zero out padded tail elements (beyond the original element count).
        rows, cols = acc_ref.shape
        row_idx = jax.lax.broadcasted_iota(jnp.int32, (rows, cols), 0)
        col_idx = jax.lax.broadcasted_iota(jnp.int32, (rows, cols), 1)
        flat_idx = (i * tm + row_idx) * cols + col_idx
        f_loss = jnp.where(flat_idx < n_valid, f_loss, 0.0)

    # Per-lane partial sums every step; cross-lane reduce only once at the end.
    acc_ref[...] += f_loss

    @pl.when(i == pl.num_programs(0) - 1)
    def _finalize():
        total = jnp.sum(acc_ref[...])
        o_ref[...] = (total / n_valid).reshape(1, 1).astype(o_ref.dtype)


@functools.partial(jax.jit, static_argnames=("alpha", "gamma", "tm"))
def focal_loss(inputs, targets, *, alpha=0.25, gamma=2, tm=256):
    """Mean focal loss over all elements. inputs are probabilities in (0, 1)."""
    assert inputs.shape == targets.shape
    n = inputs.size

    rows = pl.cdiv(n, _LANES)
    # Row tile: multiple of 8 sublanes; capped so tiny inputs don't over-pad.
    tm_eff = max(8, min(tm, ((rows + 7) // 8) * 8))
    rows_padded = ((rows + tm_eff - 1) // tm_eff) * tm_eff
    total_padded = rows_padded * _LANES
    pad = total_padded - n

    x = jnp.pad(inputs.reshape(-1).astype(jnp.float32), (0, pad),
                constant_values=0.5).reshape(rows_padded, _LANES)
    t = jnp.pad(targets.reshape(-1).astype(jnp.float32), (0, pad),
                constant_values=0.0).reshape(rows_padded, _LANES)

    grid = (rows_padded // tm_eff,)
    kernel = functools.partial(
        focal_loss_kernel, alpha=float(alpha), gamma=gamma,
        n_valid=n, tm=tm_eff, masked=(pad != 0))

    out = pl.pallas_call(
        kernel,
        out_shape=jax.ShapeDtypeStruct((1, 1), jnp.float32),
        grid_spec=pltpu.PrefetchScalarGridSpec(
            num_scalar_prefetch=0,
            grid=grid,
            in_specs=[
                pl.BlockSpec((tm_eff, _LANES), lambda i: (i, 0)),  # inputs
                pl.BlockSpec((tm_eff, _LANES), lambda i: (i, 0)),  # targets
            ],
            out_specs=pl.BlockSpec((1, 1), lambda i: (0, 0)),      # resident scalar out
            scratch_shapes=[pltpu.VMEM((tm_eff, _LANES), jnp.float32)],
        ),
        compiler_params=pltpu.CompilerParams(
            dimension_semantics=("arbitrary",),          # reduction axis
            vmem_limit_bytes=64 * 1024 * 1024,
        ),
        cost_estimate=pl.CostEstimate(
            flops=12 * total_padded,
            transcendentals=3 * total_padded,
            bytes_accessed=2 * 4 * total_padded + 4,
        ),
    )(x, t)
    return out[0, 0]


if __name__ == "__main__":
    key = jax.random.PRNGKey(0)
    k_p, k_t = jax.random.split(key)

    # Detector-style probabilities and binary targets at a small shape.
    shape = (2, 4, 16, 16)
    inputs = jax.random.uniform(k_p, shape, jnp.float32,
                                minval=1e-4, maxval=1.0 - 1e-4)
    targets = (jax.random.uniform(k_t, shape, jnp.float32) > 0.7).astype(jnp.float32)

    alpha, gamma = 0.25, 2
    out = focal_loss(inputs, targets, alpha=alpha, gamma=gamma)
    out = jax.block_until_ready(out)

    # Pure-JAX reference (same math as the torch forward).
    p = inputs.astype(jnp.float32)
    t = targets.astype(jnp.float32)
    bce = -(t * jnp.maximum(jnp.log(p), -100.0)
            + (1.0 - t) * jnp.maximum(jnp.log(1.0 - p), -100.0))
    pt = jnp.exp(-bce)
    ref = jnp.mean(alpha * (1.0 - pt) ** gamma * bce)

    assert out.shape == ()
    assert jnp.allclose(out, ref, atol=1e-6, rtol=1e-4), (out, ref)

    # TODO(synk): the module's `logits` flag is never used in forward() (it always calls
    # binary_cross_entropy on probabilities), so no logits path is implemented here.
    print("KERNEL_OK")
</pallas_src>

<mosaic_0001>
module attributes {stable_mosaic.version = 11 : i64} {
  func.func @focal_loss_kernel(%arg0: i32, %arg1: memref<16x128xf32, #tpu.memory_space<vmem>>, %arg2: memref<16x128xf32, #tpu.memory_space<vmem>>, %arg3: memref<1x1xf32, #tpu.memory_space<vmem>>, %arg4: memref<16x128xf32, #tpu.memory_space<vmem>>) attributes {dimension_semantics = [#tpu.dimension_semantics<arbitrary>], iteration_bounds = array<i64: 1>, scalar_prefetch = 0 : i64, scratch_operands = 1 : i64, tpu.core_type = #tpu.core_type<tc>, window_params = [{transform_indices = @transform_0, window_bounds = array<i64: 16, 128>}, {transform_indices = @transform_1, window_bounds = array<i64: 16, 128>}, {pipeline_mode = #tpu.pipeline_mode<synchronous>, transform_indices = @transform_2, window_bounds = array<i64: 1, 1>}]} {
    %c0_i32 = arith.constant 0 : i32
    %0 = arith.cmpi eq, %arg0, %c0_i32 : i32
    %1 = arith.extui %0 : i1 to i32
    %c0_i32_0 = arith.constant 0 : i32
    %2 = arith.cmpi ne, %1, %c0_i32_0 : i32
    scf.if %2 {
      %cst_17 = arith.constant 0.000000e+00 : f32
      %35 = vector.broadcast %cst_17 : f32 to vector<16x128xf32>
      %c0_18 = arith.constant 0 : index
      %c0_19 = arith.constant 0 : index
      %36 = vector.load %arg4[%c0_18, %c0_19] : memref<16x128xf32, #tpu.memory_space<vmem>>, vector<16x128xf32>
      tpu.vector_store %arg4[%c0_18, %c0_19], %35 {strides = array<i32>} : memref<16x128xf32, #tpu.memory_space<vmem>>, vector<16x128xf32>,
    } else {
    }
    %c0 = arith.constant 0 : index
    %c0_1 = arith.constant 0 : index
    %3 = vector.load %arg1[%c0, %c0_1] : memref<16x128xf32, #tpu.memory_space<vmem>>, vector<16x128xf32>
    %c0_2 = arith.constant 0 : index
    %c0_3 = arith.constant 0 : index
    %4 = vector.load %arg2[%c0_2, %c0_3] : memref<16x128xf32, #tpu.memory_space<vmem>>, vector<16x128xf32>
    %5 = math.log %3 : vector<16x128xf32>
    %cst = arith.constant -1.000000e+02 : f32
    %6 = vector.broadcast %cst : f32 to vector<16x128xf32>
    %7 = arith.maximumf %5, %6 : vector<16x128xf32>
    %cst_4 = arith.constant 1.000000e+00 : f32
    %8 = vector.broadcast %cst_4 : f32 to vector<16x128xf32>
    %9 = arith.subf %8, %3 : vector<16x128xf32>
    %10 = math.log %9 : vector<16x128xf32>
    %cst_5 = arith.constant -1.000000e+02 : f32
    %11 = vector.broadcast %cst_5 : f32 to vector<16x128xf32>
    %12 = arith.maximumf %10, %11 : vector<16x128xf32>
    %13 = arith.mulf %4, %7 : vector<16x128xf32>
    %cst_6 = arith.constant 1.000000e+00 : f32
    %14 = vector.broadcast %cst_6 : f32 to vector<16x128xf32>
    %15 = arith.subf %14, %4 : vector<16x128xf32>
    %16 = arith.mulf %15, %12 : vector<16x128xf32>
    %17 = arith.addf %13, %16 : vector<16x128xf32>
    %cst_7 = arith.constant 0.000000e+00 : f32
    %18 = vector.broadcast %cst_7 : f32 to vector<16x128xf32>
    %19 = arith.subf %18, %17 : vector<16x128xf32>
    %cst_8 = arith.constant 0.000000e+00 : f32
    %20 = vector.broadcast %cst_8 : f32 to vector<16x128xf32>
    %21 = arith.subf %20, %19 : vector<16x128xf32>
    %22 = math.exp %21 : vector<16x128xf32>
    %cst_9 = arith.constant 1.000000e+00 : f32
    %23 = vector.broadcast %cst_9 : f32 to vector<16x128xf32>
    %24 = arith.subf %23, %22 : vector<16x128xf32>
    %25 = arith.mulf %24, %24 : vector<16x128xf32>
    %cst_10 = arith.constant 2.500000e-01 : f32
    %26 = vector.broadcast %cst_10 : f32 to vector<16x128xf32>
    %27 = arith.mulf %26, %25 : vector<16x128xf32>
    %28 = arith.mulf %27, %19 : vector<16x128xf32>
    %c0_11 = arith.constant 0 : index
    %c0_12 = arith.constant 0 : index
    %29 = vector.load %arg4[%c0_11, %c0_12] : memref<16x128xf32, #tpu.memory_space<vmem>>, vector<16x128xf32>
    %30 = arith.addf %29, %28 : vector<16x128xf32>
    %c0_13 = arith.constant 0 : index
    %c0_14 = arith.constant 0 : index
    %31 = vector.load %arg4[%c0_13, %c0_14] : memref<16x128xf32, #tpu.memory_space<vmem>>, vector<16x128xf32>
    tpu.vector_store %arg4[%c0_13, %c0_14], %30 {strides = array<i32>} : memref<16x128xf32, #tpu.memory_space<vmem>>, vector<16x128xf32>,
    %c0_i32_15 = arith.constant 0 : i32
    %32 = arith.cmpi eq, %arg0, %c0_i32_15 : i32
    %33 = arith.extui %32 : i1 to i32
    %c0_i32_16 = arith.constant 0 : i32
    %34 = arith.cmpi ne, %33, %c0_i32_16 : i32
    scf.if %34 {
      %c0_17 = arith.constant 0 : index
      %c0_18 = arith.constant 0 : index
      %35 = vector.load %arg4[%c0_17, %c0_18] : memref<16x128xf32, #tpu.memory_space<vmem>>, vector<16x128xf32>
      %36 = vector.shape_cast %35 : vector<16x128xf32> to vector<1x16x128xf32>
      %cst_19 = arith.constant dense<0.000000e+00> : vector<1xf32>
      %37 = vector.multi_reduction <add>, %36, %cst_19 [1, 2] : vector<1x16x128xf32> to vector<1xf32>
      %38 = vector.shape_cast %37 : vector<1xf32> to vector<1x1x1xf32>
      %39 = vector.extract %38[0, 0, 0] : f32 from vector<1x1x1xf32>
      %cst_20 = arith.constant 2.048000e+03 : f32
      %40 = arith.divf %39, %cst_20 : f32
      %41 = vector.broadcast %40 : f32 to vector<1x1xf32>
      %c0_21 = arith.constant 0 : index
      %c0_22 = arith.constant 0 : index
      %42 = vector.load %arg3[%c0_21, %c0_22] : memref<1x1xf32, #tpu.memory_space<vmem>>, vector<1x1xf32>
      tpu.vector_store %arg3[%c0_21, %c0_22], %41 {strides = array<i32>} : memref<1x1xf32, #tpu.memory_space<vmem>>, vector<1x1xf32>,
    } else {
    }
    return
  }
  func.func @transform_0(%arg0: i32) -> (i32, i32) {
    %c0_i32 = arith.constant 0 : i32
    %c0_i32_0 = arith.constant 0 : i32
    return %arg0, %c0_i32 : i32, i32
  }
  func.func @transform_1(%arg0: i32) -> (i32, i32) {
    %c0_i32 = arith.constant 0 : i32
    %c0_i32_0 = arith.constant 0 : i32
    return %arg0, %c0_i32 : i32, i32
  }
  func.func @transform_2(%arg0: i32) -> (i32, i32) {
    %c0_i32 = arith.constant 0 : i32
    %c0_i32_0 = arith.constant 0 : i32
    %c0_i32_1 = arith.constant 0 : i32
    return %c0_i32, %c0_i32_0 : i32, i32
  }
}

</mosaic_0001>

<bundles_post_ra>
// kernel: focal_loss.1
= control target key start
LH: loop header
LB: loop body
LE: loop exit
PB: predicated region body
PF: predicated region fallthrough
CT: control target
= control target key end

     0   :  { %s187_s0 = inlined_call_operand.vmem [shape: f32[16,128], index: 0, kind: input, shape index: {}]   ;;  %s188_s1 = inlined_call_operand.vmem [shape: f32[16,128], index: 1, kind: input, shape index: {}]   ;;  %s189_s2 = inlined_call_operand.hbm [shape: f32[1,1], index: 2, kind: output, shape index: {}]  }
   0x1   :  { %v18_v0 = vld [vmem:[%s187_s0] sm:$0xff]  ;;  %v19_v1 = vld [vmem:[%s187_s0 + $0x8] sm:$0xff] }
   0x2   :  { %115 = vlog2.f32 %v18_v0  ;;  %v28_v2 = vsub.f32 1.0, %v18_v0  ;;  %v29_v3 = vsub.f32 1.0, %v19_v1 }
   0x3   :  { %7 = vsyncpa [#allocation4], 0  ;;  %117 = vlog2.f32 %v19_v1  ;;  %v20_v5 = vld [vmem:[%s188_s1] sm:$0xff]  ;;  %v21_v7 = vld [vmem:[%s188_s1 + $0x8] sm:$0xff]  ;;  %v155_v43 = vmov 2048.0   ;;  %s156_s0 = smov [#allocation3]  }
   0x4   :  { %119 = vlog2.f32 %v28_v2  ;;  %v38_v14 = vsub.f32 1.0, %v20_v5  ;;  %v39_v17 = vsub.f32 1.0, %v21_v7  ;;  %s98_s1 = sshll.u32 %s156_s0, 4  ;;  %s100_s20 = sshll.u32 %s189_s2, 4  ;;  %vm91_vm1 = vcmask 0   ;;  %s99_s1 = int_to_ptr.vmem [resolvable:$true] %s98_s1  ;;  %s101_s20 = int_to_ptr.hbm [resolvable:$true] %s100_s20 }
   0x5   :  { %121 = vlog2.f32 %v29_v3 }
   0x8   :  { %v116_v4 = vpop.eup %115 }
   0x9   :  { %v118_v6 = vpop.eup %117  ;;  %v23_v8 = vmul.f32 0.6931472, %v116_v4 }
   0xa   :  { %v120_v9 = vpop.eup %119  ;;  %v25_v10 = vmul.f32 0.6931472, %v118_v6 }
   0xb   :  { %v122_v11 = vpop.eup %121  ;;  %v26_v12 = vmax.f32 %v23_v8, -100.0  ;;  %v31_v13 = vmul.f32 0.6931472, %v120_v9 }
   0xc   :  { %v27_v15 = vmax.f32 %v25_v10, -100.0  ;;  %v33_v16 = vmul.f32 0.6931472, %v122_v11 }
   0xd   :  { %v34_v18 = vmax.f32 %v31_v13, -100.0  ;;  %v36_v19 = vmul.f32 %v26_v12, %v20_v5 }
   0xe   :  { %v35_v20 = vmax.f32 %v33_v16, -100.0  ;;  %v37_v21 = vmul.f32 %v27_v15, %v21_v7 }
   0xf   :  { %v40_v22 = vmul.f32 %v38_v14, %v34_v18 }
  0x10   :  { %v41_v23 = vmul.f32 %v39_v17, %v35_v20 }
  0x11   :  { %v42_v24 = vadd.f32 %v40_v22, %v36_v19 }
  0x12   :  { %v43_v25 = vadd.f32 %v41_v23, %v37_v21 }
  0x13   :  { %v44_v26 = vsub.f32 0.0, %v42_v24 }
  0x14   :  { %v45_v27 = vsub.f32 0.0, %v43_v25 }
  0x15   :  { %v46_v28 = vsub.f32 0.0, %v44_v26 }
  0x16   :  { %v47_v29 = vsub.f32 0.0, %v45_v27 }
  0x17   :  { %v48_v30 = vmul.f32 1.442695, %v46_v28 }
  0x18   :  { %v50_v31 = vmul.f32 1.442695, %v47_v29 }
  0x19   :  { %123 = vpow2.f32 %v48_v30 }
  0x1a   :  { %125 = vpow2.f32 %v50_v31 }
  0x1b   :  { %127 = vrcp.f32 %v155_v43 }
  0x1f   :  { %v124_v32 = vpop.eup %123 }
  0x20   :  { %v126_v33 = vpop.eup %125  ;;  %v52_v34 = vsub.f32 1.0, %v124_v32 }
  0x21   :  { %v53_v35 = vsub.f32 1.0, %v126_v33  ;;  %v128_v44 = vpop.eup %127 }
  0x22   :  { %v54_v36 = vmul.f32 %v52_v34, %v52_v34  ;;  %v82_v45 = vmul.f32 2048.0, %v128_v44  ;;  %vm86_vm0 = vweird.f32 %v128_v44 }
  0x23   :  { %v55_v37 = vmul.f32 %v53_v35, %v53_v35 }
  0x24   :  { %v56_v38 = vmul.f32 0.25, %v54_v36  ;;  %v83_v46 = vsub.f32 1.0, %v82_v45 }
  0x25   :  { %v57_v39 = vmul.f32 0.25, %v55_v37 }
  0x26   :  { %v58_v40 = vmul.f32 %v56_v38, %v44_v26  ;;  %v84_v50 = vmul.f32 %v128_v44, %v83_v46 }
  0x27   :  { %v59_v41 = vmul.f32 %v57_v39, %v45_v27 }
  0x28   :  { %v85_v53 = vadd.f32 %v128_v44, %v84_v50 }
  0x29   :  { %v71_v42 = vadd.f32 %v59_v41, %v58_v40 }
  0x2a   :  { %v87_v56 = vsel %vm86_vm0, %v128_v44, %v85_v53 }
  0x2b   :  { %72 = vadd.xlane.f32.xlu0 %v71_v42 }
  0x9e   :  { %v73_v47 = vpop.xlane.xlu0 %72 }
  0x9f   :  { %v74_v48 = vrot.slane %v73_v47, 4 }
  0xa1   :  { %v75_v49 = vadd.f32 %v74_v48, %v73_v47 }
  0xa3   :  { %v76_v51 = vrot.slane %v75_v49, 2 }
  0xa5   :  { %v77_v52 = vadd.f32 %v76_v51, %v75_v49 }
  0xa7   :  { %v78_v54 = vrot.slane %v77_v52, 1 }
  0xa9   :  { %v79_v55 = vadd.f32 %v78_v54, %v77_v52 }
  0xab   :  { %109 = vpush %v79_v55 }
  0xac   :  { %111 = vpush %v87_v56 }
  0xdc   :  { %s110_s17 = spop %109 }
  0xdd   :  { %s112_s21 = spop %111 }
  0xde   :  { %s89_s22 = smul.f32 %s112_s21, %s110_s17 }
  0xe0   :  { %v90_v57 = vstv %s89_s22 }
  0xe1   :  { %92 = vst.msk [vmem:[#allocation3] sm:$0x1] %vm91_vm1, %v90_v57 }
  0xe2   :  { %103 = dma.vmem_to_hbm [thread:$0]  %s99_s1, 16, %s101_s20, [#allocation4]  }
  0xe3   :  { %153 = dma.done.wait [#allocation4], 16  }
  0xe4   :  { %154 = vsyncadd [#allocation4], 4294967280 }
  0xe5   :  { %108 = vsyncpa [#allocation4], 1 }

</bundles_post_ra>
